<compile_context>
chip_gen: v7x
topology: tpu7x:2x2x1
jax: 0.10.0
libtpu: 0.0.40
codegen_flags: <defaults>
</compile_context>

<pallas_src>
import functools

import jax
import jax.numpy as jnp
from jax.experimental import pallas as pl
from jax.experimental.pallas import tpu as pltpu


def _round_up(a: int, b: int) -> int:
    return ((a + b - 1) // b) * b


def _image_recover_kernel(x_ref, w1_ref, b1_ref, w2_ref, b2_ref, out_ref):
    # Reg_Block: Linear(H0 -> H1) + ReLU   (Dropout = eval-mode identity)
    h = jnp.dot(x_ref[...], w1_ref[...],
                preferred_element_type=jnp.float32) + b1_ref[...]
    h = jnp.maximum(h, 0.0)
    # Head: Linear(H1 -> output_dim)
    out = jnp.dot(h.astype(w2_ref.dtype), w2_ref[...],
                  preferred_element_type=jnp.float32) + b2_ref[...]
    out_ref[...] = out.astype(out_ref.dtype)


def image_recover_forward(x, params, *, tile_n: int = 1024, use_bf16: bool = False):
    """x: (..., hidden_size[0]) float32. Returns image_feature: (..., output_dim)."""
    w1, b1, w2, b2 = params
    H0, H1 = w1.shape
    Dout = w2.shape[1]
    assert x.shape[-1] == H0, "last dim of x must equal hidden_size[0]"

    lead_shape = x.shape[:-1]
    x2d = x.reshape(-1, H0)
    n_rows = x2d.shape[0]

    # Row-tile size: multiple of 8 (sublane), no bigger than the (padded) problem.
    # Per-generation guidance: ~1024 rows f32 fits comfortably under v7x's scoped VMEM;
    # v6e/v5e could go larger but gain little once >=512 rows (HBM roofline reached).
    tile = min(tile_n, _round_up(n_rows, 8))
    tile = _round_up(tile, 8)
    n_pad = _round_up(n_rows, tile)
    if n_pad != n_rows:
        x2d = jnp.pad(x2d, ((0, n_pad - n_rows), (0, 0)))

    if use_bf16:
        # bf16 MXU inputs, f32 accumulation; biases / elementwise stay f32 (v5e-safe).
        x2d = x2d.astype(jnp.bfloat16)
        w1 = w1.astype(jnp.bfloat16)
        w2 = w2.astype(jnp.bfloat16)

    grid = (n_pad // tile,)

    in_specs = [
        pl.BlockSpec((tile, H0), lambda i: (i, 0)),   # x tile: streams through VMEM
        pl.BlockSpec((H0, H1), lambda i: (0, 0)),     # weights/biases: VMEM-resident
        pl.BlockSpec((1, H1), lambda i: (0, 0)),
        pl.BlockSpec((H1, Dout), lambda i: (0, 0)),
        pl.BlockSpec((1, Dout), lambda i: (0, 0)),
    ]
    out_specs = pl.BlockSpec((tile, Dout), lambda i: (i, 0))
    out_shape = jax.ShapeDtypeStruct((n_pad, Dout), jnp.float32)

    in_bytes = x2d.dtype.itemsize
    w_bytes = w1.dtype.itemsize
    # Double-buffered x/out tiles + resident weights + headroom.
    vmem_bytes = (2 * tile * (H0 * in_bytes + Dout * 4)
                  + (H0 * H1 + H1 * Dout) * w_bytes
                  + (H1 + Dout) * 4
                  + (4 << 20))
    vmem_limit = int(min(max(vmem_bytes, 8 << 20), 32 << 20))

    cost = pl.CostEstimate(
        flops=2 * n_pad * (H0 * H1 + H1 * Dout),
        transcendentals=0,
        bytes_accessed=n_pad * (H0 * in_bytes + Dout * 4)
        + (H0 * H1 + H1 * Dout) * w_bytes,
    )

    out = pl.pallas_call(
        _image_recover_kernel,
        grid=grid,
        in_specs=in_specs,
        out_specs=out_specs,
        out_shape=out_shape,
        compiler_params=pltpu.CompilerParams(
            dimension_semantics=("parallel",),   # row tiles independent -> megacore on v7x
            vmem_limit_bytes=vmem_limit,
        ),
        cost_estimate=cost,
    )(x2d, w1, b1, w2, b2)

    return out[:n_rows].reshape(*lead_shape, Dout)


def make_params(key, hidden_size, output_dim):
    """PyTorch-style Linear init: U(-1/sqrt(fan_in), 1/sqrt(fan_in)) for W and b."""
    H0, H1 = hidden_size
    ks = jax.random.split(key, 4)

    def lin(kw, kb, fan_in, fan_out):
        bound = 1.0 / jnp.sqrt(fan_in)
        w = jax.random.uniform(kw, (fan_in, fan_out), jnp.float32, -bound, bound)
        b = jax.random.uniform(kb, (1, fan_out), jnp.float32, -bound, bound)
        return w, b

    w1, b1 = lin(ks[0], ks[1], H0, H1)
    w2, b2 = lin(ks[2], ks[3], H1, output_dim)
    # TODO(synk): Reg_Block assumed Linear->ReLU->Dropout; dropout is eval-mode identity here.
    return (w1, b1, w2, b2)


def _reference(x, params):
    w1, b1, w2, b2 = params
    h = jnp.maximum(x @ w1 + b1, 0.0)
    return h @ w2 + b2


if __name__ == "__main__":
    key = jax.random.PRNGKey(0)
    B, N = 2, 16
    hidden_size = [128, 64]
    output_dim = 32

    kx, kp = jax.random.split(key)
    x = jax.random.normal(kx, (B, N, hidden_size[0]), jnp.float32)
    params = make_params(kp, hidden_size, output_dim)

    # Single-tile path.
    out = image_recover_forward(x, params)
    jax.block_until_ready(out)
    ref = _reference(x, params)
    assert out.shape == (B, N, output_dim)
    assert jnp.allclose(out, ref, atol=1e-4, rtol=1e-4)

    # Multi-tile path (grid > 1), exercises pipelining over row tiles.
    out_tiled = image_recover_forward(x, params, tile_n=8)
    jax.block_until_ready(out_tiled)
    assert jnp.allclose(out_tiled, ref, atol=1e-4, rtol=1e-4)

    # Ragged row count (padding + output slice path).
    x_ragged = x[:, :13]                       # 26 rows total -> padded to 32, tile=8
    out_ragged = image_recover_forward(x_ragged, params, tile_n=8)
    jax.block_until_ready(out_ragged)
    assert jnp.allclose(out_ragged, _reference(x_ragged, params), atol=1e-4, rtol=1e-4)

    # bf16 MXU-input path (looser tolerance, f32 accumulation).
    out_bf16 = image_recover_forward(x, params, use_bf16=True)
    jax.block_until_ready(out_bf16)
    assert jnp.allclose(out_bf16, ref, atol=5e-2, rtol=5e-2)

    print("KERNEL_OK")
</pallas_src>

<mosaic_0001>
module attributes {stable_mosaic.version = 11 : i64} {
  func.func @_image_recover_kernel(%arg0: i32, %arg1: memref<32x128xf32, #tpu.memory_space<vmem>>, %arg2: memref<128x64xf32, #tpu.memory_space<vmem>>, %arg3: memref<1x64xf32, #tpu.memory_space<vmem>>, %arg4: memref<64x32xf32, #tpu.memory_space<vmem>>, %arg5: memref<1x32xf32, #tpu.memory_space<vmem>>, %arg6: memref<32x32xf32, #tpu.memory_space<vmem>>) attributes {dimension_semantics = [#tpu.dimension_semantics<parallel>], iteration_bounds = array<i64: 1>, scalar_prefetch = 0 : i64, scratch_operands = 0 : i64, tpu.core_type = #tpu.core_type<tc>, window_params = [{transform_indices = @transform_0, window_bounds = array<i64: 32, 128>}, {pipeline_mode = #tpu.pipeline_mode<synchronous>, transform_indices = @transform_1, window_bounds = array<i64: 128, 64>}, {pipeline_mode = #tpu.pipeline_mode<synchronous>, transform_indices = @transform_2, window_bounds = array<i64: 1, 64>}, {pipeline_mode = #tpu.pipeline_mode<synchronous>, transform_indices = @transform_3, window_bounds = array<i64: 64, 32>}, {pipeline_mode = #tpu.pipeline_mode<synchronous>, transform_indices = @transform_4, window_bounds = array<i64: 1, 32>}, {transform_indices = @transform_5, window_bounds = array<i64: 32, 32>}]} {
    %c0 = arith.constant 0 : index
    %c0_0 = arith.constant 0 : index
    %0 = vector.load %arg1[%c0, %c0_0] : memref<32x128xf32, #tpu.memory_space<vmem>>, vector<32x128xf32>
    %c0_1 = arith.constant 0 : index
    %c0_2 = arith.constant 0 : index
    %1 = vector.load %arg2[%c0_1, %c0_2] : memref<128x64xf32, #tpu.memory_space<vmem>>, vector<128x64xf32>
    %cst = arith.constant dense<0.000000e+00> : vector<32x64xf32>
    %2 = tpu.matmul %0, %1, %cst {dimension_numbers = #tpu.dot_dimension_numbers<[1], [0], [0], [1], [0, 0, 1, 1], [], []>} : vector<32x128xf32>, vector<128x64xf32>, vector<32x64xf32> -> vector<32x64xf32>
    %c0_3 = arith.constant 0 : index
    %c0_4 = arith.constant 0 : index
    %3 = vector.load %arg3[%c0_3, %c0_4] : memref<1x64xf32, #tpu.memory_space<vmem>>, vector<1x64xf32>
    %4 = vector.broadcast %3 : vector<1x64xf32> to vector<32x64xf32>
    %5 = arith.addf %2, %4 : vector<32x64xf32>
    %cst_5 = arith.constant 0.000000e+00 : f32
    %6 = vector.broadcast %cst_5 : f32 to vector<32x64xf32>
    %7 = arith.maximumf %5, %6 : vector<32x64xf32>
    %c0_6 = arith.constant 0 : index
    %c0_7 = arith.constant 0 : index
    %8 = vector.load %arg4[%c0_6, %c0_7] : memref<64x32xf32, #tpu.memory_space<vmem>>, vector<64x32xf32>
    %cst_8 = arith.constant dense<0.000000e+00> : vector<32x32xf32>
    %9 = tpu.matmul %7, %8, %cst_8 {dimension_numbers = #tpu.dot_dimension_numbers<[1], [0], [0], [1], [0, 0, 1, 1], [], []>} : vector<32x64xf32>, vector<64x32xf32>, vector<32x32xf32> -> vector<32x32xf32>
    %c0_9 = arith.constant 0 : index
    %c0_10 = arith.constant 0 : index
    %10 = vector.load %arg5[%c0_9, %c0_10] : memref<1x32xf32, #tpu.memory_space<vmem>>, vector<1x32xf32>
    %11 = vector.broadcast %10 : vector<1x32xf32> to vector<32x32xf32>
    %12 = arith.addf %9, %11 : vector<32x32xf32>
    %c0_11 = arith.constant 0 : index
    %c0_12 = arith.constant 0 : index
    %13 = vector.load %arg6[%c0_11, %c0_12] : memref<32x32xf32, #tpu.memory_space<vmem>>, vector<32x32xf32>
    tpu.vector_store %arg6[%c0_11, %c0_12], %12 {strides = array<i32>} : memref<32x32xf32, #tpu.memory_space<vmem>>, vector<32x32xf32>,
    return
  }
  func.func @transform_0(%arg0: i32) -> (i32, i32) {
    %c0_i32 = arith.constant 0 : i32
    %c0_i32_0 = arith.constant 0 : i32
    return %arg0, %c0_i32 : i32, i32
  }
  func.func @transform_1(%arg0: i32) -> (i32, i32) {
    %c0_i32 = arith.constant 0 : i32
    %c0_i32_0 = arith.constant 0 : i32
    %c0_i32_1 = arith.constant 0 : i32
    return %c0_i32, %c0_i32_0 : i32, i32
  }
  func.func @transform_2(%arg0: i32) -> (i32, i32) {
    %c0_i32 = arith.constant 0 : i32
    %c0_i32_0 = arith.constant 0 : i32
    %c0_i32_1 = arith.constant 0 : i32
    return %c0_i32, %c0_i32_0 : i32, i32
  }
  func.func @transform_3(%arg0: i32) -> (i32, i32) {
    %c0_i32 = arith.constant 0 : i32
    %c0_i32_0 = arith.constant 0 : i32
    %c0_i32_1 = arith.constant 0 : i32
    return %c0_i32, %c0_i32_0 : i32, i32
  }
  func.func @transform_4(%arg0: i32) -> (i32, i32) {
    %c0_i32 = arith.constant 0 : i32
    %c0_i32_0 = arith.constant 0 : i32
    %c0_i32_1 = arith.constant 0 : i32
    return %c0_i32, %c0_i32_0 : i32, i32
  }
  func.func @transform_5(%arg0: i32) -> (i32, i32) {
    %c0_i32 = arith.constant 0 : i32
    %c0_i32_0 = arith.constant 0 : i32
    return %arg0, %c0_i32 : i32, i32
  }
}

</mosaic_0001>

<bundles_post_ra>
// kernel: tpu_custom_call.1
= control target key start
LH: loop header
LB: loop body
LE: loop exit
PB: predicated region body
PF: predicated region fallthrough
CT: control target
= control target key end

     0   :  { %s579_s0 = inlined_call_operand.vmem [shape: f32[32,128], index: 0, kind: input, shape index: {}]   ;;  %s580_s1 = inlined_call_operand.vmem [shape: f32[128,64], index: 1, kind: input, shape index: {}]   ;;  %s581_s2 = inlined_call_operand.vmem [shape: f32[1,64], index: 2, kind: input, shape index: {}]   ;;  %s582_s3 = inlined_call_operand.vmem [shape: f32[64,32], index: 3, kind: input, shape index: {}]   ;;  %s583_s4 = inlined_call_operand.vmem [shape: f32[1,32], index: 4, kind: input, shape index: {}]   ;;  %s584_s5 = inlined_call_operand.hbm [shape: f32[32,32], index: 5, kind: output, shape index: {}]  }
   0x1   :  { %v25_v0 = vld [vmem:[%s580_s1] sm:$0xff]  ;;  %v26_v1 = vld [vmem:[%s580_s1 + $0x8] sm:$0xff]  ;;  %v27_v2 = vld [vmem:[%s580_s1 + $0x10] sm:$0xff] }
   0x2   :  { %v369_v3 = vpack.c.bf16 %v26_v1, %v25_v0  ;;  %v28_v4 = vld [vmem:[%s580_s1 + $0x18] sm:$0xff]  ;;  %v29_v6 = vld [vmem:[%s580_s1 + $0x20] sm:$0xff]  ;;  %v30_v7 = vld [vmem:[%s580_s1 + $0x28] sm:$0xff] }
   0x3   :  { %v373_v5 = vpack.c.bf16 %v28_v4, %v27_v2  ;;  %v377_v8 = vpack.c.bf16 %v30_v7, %v29_v6  ;;  %v21_v9 = vld [vmem:[%s579_s0] sm:$0xff]  ;;  %v31_v10 = vld [vmem:[%s580_s1 + $0x30] sm:$0xff]  ;;  %v32_v11 = vld [vmem:[%s580_s1 + $0x38] sm:$0xff] }
   0x4   :  { %370 = vmatprep.subr.bf16.mxu0 %v369_v3  ;;  %341 = vmatprep.mubr.f32.mxu0 %v21_v9  ;;  %v137_v12 = vld [vmem:[%s582_s3] sm:$0xff]  ;;  %v138_v13 = vld [vmem:[%s582_s3 + $0x8] sm:$0xff]  ;;  %v139_v14 = vld [vmem:[%s582_s3 + $0x10] sm:$0xff] }
   0x5   :  { %372 = vmatpush3.bf16.msra.mxu0 %v369_v3  ;;  %v140_v15 = vld [vmem:[%s582_s3 + $0x18] sm:$0xff]  ;;  %v401_v16 = vpack.c.bf16 %v138_v13, %v137_v12 }
   0x6   :  { %374 = vmatprep.subr.bf16.mxu0 %v373_v5  ;;  %v405_v17 = vpack.c.bf16 %v140_v15, %v139_v14 }
   0x9   :  { %376 = vmatpush3.bf16.msra.mxu0 %v373_v5 }
   0xa   :  { %10 = vsyncpa [#allocation3], 0  ;;  %378 = vmatprep.subr.bf16.mxu0 %v377_v8  ;;  %v381_v18 = vpack.c.bf16 %v32_v11, %v31_v10  ;;  %v141_v19 = vld [vmem:[%s582_s3 + $0x20] sm:$0xff]  ;;  %v142_v20 = vld [vmem:[%s582_s3 + $0x28] sm:$0xff]  ;;  %402 = vmatprep.subr.bf16.mxu1 %v401_v16  ;;  %vm152_vm0 = vcmask 523264   ;;  %vm250_vm1 = vcmask 261120  }
   0xb   :  { %v33_v21 = vld [vmem:[%s580_s1 + $0x40] sm:$0xff]  ;;  %v34_v22 = vld [vmem:[%s580_s1 + $0x48] sm:$0xff]  ;;  %404 = vmatpush3.bf16.msra.mxu1 %v401_v16  ;;  %v409_v23 = vpack.c.bf16 %v142_v20, %v141_v19  ;;  %v35_v25 = vld [vmem:[%s580_s1 + $0x50] sm:$0xff] }
   0xc   :  { %406 = vmatprep.subr.bf16.mxu1 %v405_v17  ;;  %v385_v24 = vpack.c.bf16 %v34_v22, %v33_v21  ;;  %v36_v26 = vld [vmem:[%s580_s1 + $0x58] sm:$0xff]  ;;  %v37_v28 = vld [vmem:[%s580_s1 + $0x60] sm:$0xff]  ;;  %v38_v29 = vld [vmem:[%s580_s1 + $0x68] sm:$0xff] }
   0xd   :  { %380 = vmatpush3.bf16.msra.mxu0 %v377_v8  ;;  %v389_v27 = vpack.c.bf16 %v36_v26, %v35_v25  ;;  %v393_v30 = vpack.c.bf16 %v38_v29, %v37_v28  ;;  %v39_v31 = vld [vmem:[%s580_s1 + $0x70] sm:$0xff]  ;;  %v40_v32 = vld [vmem:[%s580_s1 + $0x78] sm:$0xff]  ;;  %v22_v34 = vld [vmem:[%s579_s0 + $0x8] sm:$0xff] }
   0xe   :  { %382 = vmatprep.subr.bf16.mxu0 %v381_v18  ;;  %v397_v33 = vpack.c.bf16 %v40_v32, %v39_v31  ;;  %v23_v35 = vld [vmem:[%s579_s0 + $0x10] sm:$0xff]  ;;  %v24_v36 = vld [vmem:[%s579_s0 + $0x18] sm:$0xff]  ;;  %v271_v40 = vld [vmem:[%s581_s2] ss:$0 sm:$0xff]  ;;  %s444_s2 = smov [#allocation2]  }
   0xf   :  { %408 = vmatpush3.bf16.msra.mxu1 %v405_v17  ;;  %v143_v37 = vld [vmem:[%s582_s3 + $0x30] sm:$0xff]  ;;  %v144_v38 = vld [vmem:[%s582_s3 + $0x38] sm:$0xff]  ;;  %v272_v53 = vld [vmem:[%s583_s4] ss:$0 sm:$0xff]  ;;  %s260_s25 = sshll.u32 %s444_s2, 4  ;;  %s261_s25 = int_to_ptr.vmem [resolvable:$true] %s260_s25 }
  0x10   :  { %410 = vmatprep.subr.bf16.mxu1 %v409_v23  ;;  %v413_v39 = vpack.c.bf16 %v144_v38, %v143_v37  ;;  %s420_s26 = scalar_lea.vmem %s261_s25, 512  ;;  %p425_p1 = scmp.lt.s32.totalorder %s261_s25, %s261_s25 }
  0x11   :  { %384 = vmatpush3.bf16.msra.mxu0 %v381_v18  ;;  %p421_p0 = scmp.ne.s32.totalorder %s261_s25, %s420_s26  ;;  %p426_p2 = scmp.lt.s32.totalorder %s420_s26, %s420_s26 }
  0x12   :  { %386 = vmatprep.subr.bf16.mxu0 %v385_v24 }
  0x13   :  { %412 = vmatpush3.bf16.msra.mxu1 %v409_v23  ;;  %p427_p3 = por %p426_p2, %p425_p1 }
  0x14   :  { %414 = vmatprep.subr.bf16.mxu1 %v413_v39 }
  0x15   :  { %388 = vmatpush3.bf16.msra.mxu0 %v385_v24  ;;  %p428_p4 = pnand %p427_p3, %p421_p0 }
  0x16   :  { %390 = vmatprep.subr.bf16.mxu0 %v389_v27 }
  0x17   :  { %416 = vmatpush3.bf16.msra.mxu1 %v413_v39 }
  0x19   :  { %392 = vmatpush3.bf16.msra.mxu0 %v389_v27 }
  0x1a   :  { %394 = vmatprep.subr.bf16.mxu0 %v393_v30 }
  0x1d   :  { %396 = vmatpush3.bf16.msra.mxu0 %v393_v30 }
  0x1e   :  { %398 = vmatprep.subr.bf16.mxu0 %v397_v33 }
  0x21   :  { %400 = vmatpush3.bf16.msra.mxu0 %v397_v33 }
  0x24   :  { %342 = vmatmul.mubr.f32.vlgmr.msra.gmra.mrb[0].mxu0 %v22_v34 }
  0x25   :  { %344 = vmatprep.mubr.f32.mxu0 %v23_v35 }
  0x28   :  { %345 = vmatmul.mubr.f32.gmra.mrb[2].mxu0 %v24_v36 }
  0xf7   :  { %v343_v41 = vpop.f32.mrb[0].mxu0 }
  0xf8   :  { %v120_v42 = vadd.f32 %v343_v41, %v271_v40  ;;  %v114_v43 = vpop.f32.mrb[1].mxu0 }
  0xf9   :  { %v115_v44 = vadd.f32 %v271_v40, %v114_v43 }
  0xfa   :  { %v134_v47 = vmax.f32 %v120_v42, 0.0 }
  0xfb   :  { %v133_v45 = vmax.f32 %v115_v44, 0.0  ;;  %v346_v46 = vpop.f32.mrb[2].mxu0 }
  0xfc   :  { %v130_v48 = vadd.f32 %v346_v46, %v271_v40  ;;  %v124_v49 = vpop.f32.mrb[3].mxu0 }
  0xfd   :  { %v125_v50 = vadd.f32 %v271_v40, %v124_v49  ;;  %363 = vmatprep.mubr.msk.f32.mxu1 %vm152_vm0, %v133_v45 }
  0xfe   :  { %364 = vmatmul.mubr.msk.f32.vlgmr.msra.gmra.mrb[0].mxu1 %vm152_vm0, %v134_v47  ;;  %v136_v52 = vmax.f32 %v130_v48, 0.0 }
  0xff   :  { %v135_v51 = vmax.f32 %v125_v50, 0.0 }
 0x101   :  { %366 = vmatprep.mubr.msk.f32.mxu1 %vm152_vm0, %v135_v51 }
 0x102   :  { %367 = vmatmul.mubr.msk.f32.gmra.mrb[2].mxu1 %vm152_vm0, %v136_v52 }
 0x1d1   :  { %v365_v54 = vpop.f32.mrb[0].mxu1 }
 0x1d2   :  { %v237_v55 = vadd.f32 %v365_v54, %v272_v53  ;;  %v231_v56 = vpop.f32.mrb[1].mxu1 }
 0x1d3   :  { %v232_v57 = vadd.f32 %v272_v53, %v231_v56 }
 0x1d4   :  { %252 = vst.msk [vmem:[#allocation2 + $0x8] sm:$0xff] %vm250_vm1, %v237_v55 }
 0x1d5   :  { %251 = vst.msk [vmem:[#allocation2] sm:$0xff] %vm250_vm1, %v232_v57  ;;  %v368_v58 = vpop.f32.mrb[2].mxu1 }
 0x1d6   :  { %v247_v59 = vadd.f32 %v368_v58, %v272_v53  ;;  %v241_v60 = vpop.f32.mrb[3].mxu1 }
 0x1d7   :  { %v242_v61 = vadd.f32 %v272_v53, %v241_v60 }
 0x1d8   :  { %254 = vst.msk [vmem:[#allocation2 + $0x18] sm:$0xff] %vm250_vm1, %v247_v59 }
 0x1d9   :  { %253 = vst.msk [vmem:[#allocation2 + $0x10] sm:$0xff] %vm250_vm1, %v242_v61 }
 0x1da   :  { %431 = shalt.err (!%p428_p4)
}
 0x1db   :  { %s432_s28 = scalar_lea.hbm %s584_s5, 512 }
 0x1dc   :  { %p433_p5 = scmp.ne.s32.totalorder %s584_s5, %s432_s28  ;;  %p436_p6 = scmp.lt.u32.totalorder %s432_s28, %s584_s5 }
 0x1de   :  { %p438_p7 = pnand %p436_p6, %p433_p5 }
 0x1e0   :  { %441 = shalt.err (!%p438_p7)
}
 0x1e1   :  { %s445_s8 = smov 128   ;;  %s446_s9 = smov 8  }
 0x1e2   :  { %266 = dma.vmem_to_hbm [thread:$0]  %s261_s25, 512, %s584_s5, [#allocation3], %s445_s8, %s445_s8, %s446_s9  }
 0x1e3   :  { %442 = dma.done.wait [#allocation3], 512  }
 0x1e4   :  { %443 = vsyncadd [#allocation3], 4294966784 }
 0x1e5   :  { %270 = vsyncpa [#allocation3], 1 }

</bundles_post_ra>
